<compile_context>
chip_gen: v7x
topology: tpu7x:2x2x1
jax: 0.10.0
libtpu: 0.0.40
codegen_flags: <defaults>
</compile_context>

<pallas_src>
import jax
import jax.numpy as jnp
from jax.experimental import pallas as pl
from jax.experimental.pallas import tpu as pltpu

SCALE_FACTOR = 1.0 / 0.6   # ScaledSiLU scale factor
_INV_SCALE = 0.6           # folded into the sigmoid denominator


# ----------------------------------------------------------------------------
# Hardware-aware configuration (dtype + generation table; no runtime queries
# that could fail off-TPU).
# ----------------------------------------------------------------------------
def _tpu_generation():
    try:
        d = jax.devices()[0]
        if d.platform != "tpu":
            return 0
        kind = d.device_kind.lower()
    except Exception:
        return 0
    for gen in (7, 6, 5, 4):
        if f"v{gen}" in kind or f"tpu{gen}" in kind:
            return gen
    return 0


def _gen_config(gen):
    """Returns (target_tile_bytes, vmem_limit_bytes)."""
    if gen >= 7:
        # 64 MiB VMEM per TensorCore: 8 MiB tiles -> 32 MiB double-buffered.
        return 8 << 20, 48 << 20
    if gen in (5, 6):
        # 128 MiB physical VMEM: larger tiles amortize the ~0.35us step cost.
        return 12 << 20, 64 << 20
    return 8 << 20, 48 << 20


# ----------------------------------------------------------------------------
# Kernel
# ----------------------------------------------------------------------------
def _make_kernel(compute_dtype, approx_reciprocal):
    use_f32 = compute_dtype == jnp.float32

    def kernel(x_ref, o_ref):
        x = x_ref[...].astype(compute_dtype)
        # ScaledSiLU(x) = x / (0.6 * (1 + exp(-x)))   (scale folded into denom)
        denom = _INV_SCALE * (1.0 + jnp.exp(-x))
        if use_f32:
            y = x * pl.reciprocal(denom, approx=approx_reciprocal)
        else:
            # bf16-native path (v6e/v7x): no f32 upcast, halves vreg traffic.
            y = x / denom
        o_ref[...] = y.astype(o_ref.dtype)

    return kernel


# ----------------------------------------------------------------------------
# Wrapper
# ----------------------------------------------------------------------------
def _choose_columns(n, max_cols):
    """Largest multiple of 128 that is <= max_cols and divides n (or None)."""
    c = (max_cols // 128) * 128
    while c >= 128:
        if c <= n and n % c == 0:
            return c
        c -= 128
    return None


def scaled_silu(x, *, target_row_bytes=8192, donate=False, approx_reciprocal=False):
    """ScaledSiLU(x) = SiLU(x) * (1/0.6), elementwise, any shape/float dtype."""
    orig_shape, orig_dtype = x.shape, x.dtype
    n = x.size
    if n == 0:
        return x

    itemsize = jnp.dtype(orig_dtype).itemsize
    sub = {4: 8, 2: 16, 1: 32}.get(itemsize, 8)   # sublane multiple per dtype

    gen = _tpu_generation()
    target_tile_bytes, vmem_limit = _gen_config(gen)

    # bf16 VPU/EUP are native on v6e/v7x; keep f32 compute on v5e / unknown.
    if orig_dtype == jnp.bfloat16 and gen >= 6:
        compute_dtype = jnp.bfloat16
    else:
        compute_dtype = jnp.float32

    # ---- lane-dense 2-D view; column width == lane tile (contiguous slabs).
    max_cols = max(128, target_row_bytes // itemsize)
    flat = x.reshape(-1)
    cols = _choose_columns(n, max_cols)
    padded = cols is None
    if padded:
        # Ragged total size: accept one pad copy so kernel stores stay
        # lane-dense (masked narrow stores are ~4.5x slower).
        flat = jnp.pad(flat, (0, (-n) % 128))
        cols = _choose_columns(flat.size, max_cols)
    x2 = flat.reshape(-1, cols)
    R, C = x2.shape

    # ---- row tile: as large as the per-generation VMEM budget allows.
    row_bytes = C * itemsize
    tr = max(sub, (target_tile_bytes // row_bytes) // sub * sub)
    if R <= tr:
        tr = R                       # full row extent -> valid regardless of 8
    if gen >= 7 and R >= 2 * sub:
        # v7x has 2 TensorCores: keep >= 2 row blocks on the parallel axis.
        half = ((pl.cdiv(R, 2) + sub - 1) // sub) * sub
        tr = min(tr, half)

    grid = (pl.cdiv(R, tr),)

    kernel = _make_kernel(compute_dtype, approx_reciprocal)
    cost = pl.CostEstimate(
        flops=4 * n, transcendentals=n, bytes_accessed=2 * n * itemsize)

    out2 = pl.pallas_call(
        kernel,
        out_shape=jax.ShapeDtypeStruct((R, C), orig_dtype),
        grid_spec=pltpu.PrefetchScalarGridSpec(
            num_scalar_prefetch=0,
            grid=grid,
            in_specs=[pl.BlockSpec((tr, C), lambda i: (i, 0))],
            out_specs=pl.BlockSpec((tr, C), lambda i: (i, 0)),
        ),
        compiler_params=pltpu.CompilerParams(
            dimension_semantics=("parallel",),
            vmem_limit_bytes=vmem_limit,
        ),
        cost_estimate=cost,
        input_output_aliases=({0: 0} if donate else {}),
    )(x2)

    out_flat = out2.reshape(-1)
    if padded:
        out_flat = out_flat[:n]
    return out_flat.reshape(orig_shape)


def _ref_scaled_silu(x):
    xf = x.astype(jnp.float32)
    return (xf * jax.nn.sigmoid(xf) * SCALE_FACTOR).astype(x.dtype)


if __name__ == "__main__":
    key = jax.random.PRNGKey(0)

    # Activation tensor consistent with the module, e.g. [batch=2, nodes=8, hidden=32].
    x = jax.random.normal(key, (2, 8, 32), dtype=jnp.float32)
    y = jax.block_until_ready(scaled_silu(x))
    y_ref = _ref_scaled_silu(x)
    assert y.shape == x.shape and y.dtype == x.dtype
    assert jnp.allclose(y, y_ref, atol=1e-5, rtol=1e-5)

    # Ragged total size (not a multiple of 128) -> lane-dense pad path.
    x2 = jax.random.normal(jax.random.PRNGKey(1), (10, 33), dtype=jnp.float32)
    y2 = jax.block_until_ready(scaled_silu(x2))
    assert y2.shape == x2.shape
    assert jnp.allclose(y2, _ref_scaled_silu(x2), atol=1e-5, rtol=1e-5)

    # bf16 path (native bf16 compute on v6e/v7x, f32 upcast elsewhere).
    x3 = jax.random.normal(jax.random.PRNGKey(2), (4, 64, 128), dtype=jnp.bfloat16)
    y3 = jax.block_until_ready(scaled_silu(x3))
    assert y3.shape == x3.shape and y3.dtype == x3.dtype
    assert jnp.allclose(y3.astype(jnp.float32),
                        _ref_scaled_silu(x3).astype(jnp.float32),
                        atol=2e-2, rtol=2e-2)

    print("KERNEL_OK")
</pallas_src>

<mosaic_0001>
module attributes {stable_mosaic.version = 11 : i64} {
  func.func @kernel(%arg0: i32, %arg1: memref<1x512xf32, #tpu.memory_space<vmem>>, %arg2: memref<1x512xf32, #tpu.memory_space<vmem>>) attributes {dimension_semantics = [#tpu.dimension_semantics<parallel>], iteration_bounds = array<i64: 1>, scalar_prefetch = 0 : i64, scratch_operands = 0 : i64, tpu.core_type = #tpu.core_type<tc>, window_params = [{transform_indices = @transform_0, window_bounds = array<i64: 1, 512>}, {transform_indices = @transform_1, window_bounds = array<i64: 1, 512>}]} {
    %c0 = arith.constant 0 : index
    %c0_0 = arith.constant 0 : index
    %0 = vector.load %arg1[%c0, %c0_0] : memref<1x512xf32, #tpu.memory_space<vmem>>, vector<1x512xf32>
    %cst = arith.constant 0.000000e+00 : f32
    %1 = vector.broadcast %cst : f32 to vector<1x512xf32>
    %2 = arith.subf %1, %0 : vector<1x512xf32>
    %3 = math.exp %2 : vector<1x512xf32>
    %cst_1 = arith.constant 1.000000e+00 : f32
    %4 = vector.broadcast %cst_1 : f32 to vector<1x512xf32>
    %5 = arith.addf %4, %3 : vector<1x512xf32>
    %cst_2 = arith.constant 6.000000e-01 : f32
    %6 = vector.broadcast %cst_2 : f32 to vector<1x512xf32>
    %7 = arith.mulf %6, %5 : vector<1x512xf32>
    %8 = tpu.reciprocal %7 : vector<1x512xf32> -> vector<1x512xf32>
    %9 = arith.mulf %0, %8 : vector<1x512xf32>
    %c0_3 = arith.constant 0 : index
    %c0_4 = arith.constant 0 : index
    %10 = vector.load %arg2[%c0_3, %c0_4] : memref<1x512xf32, #tpu.memory_space<vmem>>, vector<1x512xf32>
    tpu.vector_store %arg2[%c0_3, %c0_4], %9 {strides = array<i32>} : memref<1x512xf32, #tpu.memory_space<vmem>>, vector<1x512xf32>,
    return
  }
  func.func @transform_0(%arg0: i32) -> (i32, i32) {
    %c0_i32 = arith.constant 0 : i32
    %c0_i32_0 = arith.constant 0 : i32
    return %arg0, %c0_i32 : i32, i32
  }
  func.func @transform_1(%arg0: i32) -> (i32, i32) {
    %c0_i32 = arith.constant 0 : i32
    %c0_i32_0 = arith.constant 0 : i32
    return %arg0, %c0_i32 : i32, i32
  }
}

</mosaic_0001>

<bundles_post_ra>
// kernel: tpu_custom_call.1
= control target key start
LH: loop header
LB: loop body
LE: loop exit
PB: predicated region body
PF: predicated region fallthrough
CT: control target
= control target key end

     0   :  { %6 = vsyncpa [#allocation3], 0  ;;  %s139_s0 = inlined_call_operand.hbm [shape: f32[1,512], index: 0, kind: input, shape index: {}]   ;;  %s140_s1 = inlined_call_operand.hbm [shape: f32[1,512], index: 1, kind: output, shape index: {}]  }
   0x1   :  { %7 = vsyncpa [#allocation4], 0  ;;  %s103_s6 = smov [#allocation2]   ;;  %s55_s10 = scalar_lea.hbm %s139_s0, 64 }
   0x2   :  { %s14_s7 = sshll.u32 %s103_s6, 4  ;;  %p56_p0 = scmp.ne.s32.totalorder %s139_s0, %s55_s10  ;;  %s15_s7 = int_to_ptr.vmem [resolvable:$true] %s14_s7 }
   0x3   :  { %p59_p1 = scmp.lt.u32.totalorder %s55_s10, %s139_s0 }
   0x5   :  { %p61_p2 = pnand %p59_p1, %p56_p0 }
   0x7   :  { %64 = shalt.err (!%p61_p2)
}
   0x8   :  { %s65_s15 = scalar_lea.vmem %s15_s7, 64  ;;  %p70_p4 = scmp.lt.s32.totalorder %s15_s7, %s15_s7 }
   0x9   :  { %p66_p3 = scmp.ne.s32.totalorder %s15_s7, %s65_s15  ;;  %p71_p5 = scmp.lt.s32.totalorder %s65_s15, %s65_s15 }
   0xb   :  { %p72_p6 = por %p71_p5, %p70_p4 }
   0xd   :  { %p73_p7 = pnand %p72_p6, %p66_p3 }
   0xf   :  { %76 = shalt.err (!%p73_p7)
}
  0x10   :  { %17 = dma.hbm_to_vmem [thread:$0]  %s139_s0, 64, %s15_s7, [#allocation3]  }
  0x11   :  { %99 = dma.done.wait [#allocation3], 64  }
  0x12   :  { %100 = vsyncadd [#allocation3], 4294967232  ;;  %v21_v0 = vld [vmem:[#allocation2] sm:$0xf]  ;;  %v29_v6 = vlaneseq  ;;  %s104_s18 = smov [#allocation5]  }
  0x13   :  { %v22_v1 = vsub.f32 0.0, %v21_v0  ;;  %s40_s19 = sshll.u32 %s104_s18, 4  ;;  %s41_s19 = int_to_ptr.vmem [resolvable:$true] %s40_s19 }
  0x14   :  { %vm31_vm0 = vcmp.lt.s32.totalorder %v29_v6, 512  ;;  %s77_s20 = scalar_lea.vmem %s41_s19, 64  ;;  %p82_p9 = scmp.lt.s32.totalorder %s41_s19, %s41_s19 }
  0x15   :  { %v23_v2 = vmul.f32 1.442695, %v22_v1  ;;  %p78_p8 = scmp.ne.s32.totalorder %s41_s19, %s77_s20  ;;  %p83_p10 = scmp.lt.s32.totalorder %s77_s20, %s77_s20 }
  0x17   :  { %51 = vpow2.f32 %v23_v2  ;;  %p84_p11 = por %p83_p10, %p82_p9 }
  0x19   :  { %p85_p12 = pnand %p84_p11, %p78_p8 }
  0x21   :  { %v52_v3 = vpop.eup %51 }
  0x22   :  { %v25_v4 = vadd.f32 1.0, %v52_v3 }
  0x24   :  { %v26_v5 = vmul.f32 0.6, %v25_v4 }
  0x26   :  { %53 = vrcp.f32 %v26_v5 }
  0x30   :  { %v54_v7 = vpop.eup %53 }
  0x31   :  { %v28_v8 = vmul.f32 %v54_v7, %v21_v0 }
  0x33   :  { %33 = vst.msk [vmem:[#allocation5] sm:$0xf] %vm31_vm0, %v28_v8 }
  0x34   :  { %88 = shalt.err (!%p85_p12)
}
  0x35   :  { %s89_s22 = scalar_lea.hbm %s140_s1, 64 }
  0x36   :  { %p90_p13 = scmp.ne.s32.totalorder %s140_s1, %s89_s22  ;;  %p93_p0 = scmp.lt.u32.totalorder %s89_s22, %s140_s1 }
  0x38   :  { %p95_p1 = pnand %p93_p0, %p90_p13 }
  0x3a   :  { %98 = shalt.err (!%p95_p1)
}
  0x3b   :  { %43 = dma.vmem_to_hbm [thread:$0]  %s41_s19, 64, %s140_s1, [#allocation4]  }
  0x3c   :  { %101 = dma.done.wait [#allocation4], 64  }
  0x3d   :  { %102 = vsyncadd [#allocation4], 4294967232 }
  0x3e   :  { %47 = vsyncpa [#allocation3], 1 }
  0x3f   :  { %48 = vsyncpa [#allocation4], 1 }

</bundles_post_ra>
